<compile_context>
chip_gen: v7x
topology: tpu7x:2x2x1
jax: 0.10.0
libtpu: 0.0.40
codegen_flags: <defaults>
</compile_context>

<pallas_src>
import jax
import jax.numpy as jnp
import numpy as np
from jax import lax
from jax.experimental import pallas as pl
from jax.experimental.pallas import tpu as pltpu


def _inv1x1_kernel(w_ref, z_ref, mask_ref, zout_ref):
    # w_ref   : (C, C)        VMEM (weight, grid-invariant)
    # z_ref   : (Bb, C, Tt)   VMEM (batch block x channels x lane-dense T tile)
    # mask_ref: (Bb, 1, Tt)   VMEM
    # zout_ref: (Bb, C, Tt)   VMEM
    w = w_ref[...]
    nb = z_ref.shape[0]

    def body(b, carry):
        # 1x1 conv over this (batch row, T tile): W @ z with f32 accumulation.
        out = jnp.dot(w, z_ref[b], preferred_element_type=jnp.float32)
        zout_ref[b] = (out * mask_ref[b]).astype(zout_ref.dtype)
        return carry

    # Static trip count; unroll only when small to keep code size sane.
    lax.fori_loop(0, nb, body, 0, unroll=(nb <= 8))


# --- tiling policy --------------------------------------------------------
_VMEM_BLOCK_BUDGET = 24 * 1024 * 1024   # double-buffered block bytes target
_VMEM_LIMIT_BYTES = 32 * 1024 * 1024    # scoped VMEM limit (raises v5e's 16 MiB default)
_MIN_GRID_STEPS = 8                     # keep both v7x TensorCores fed
_MIN_STEP_PAYLOAD = 1 * 1024 * 1024     # never shrink below ~1 MiB useful HBM/step


def _choose_tiles(B, C, T, itemsize):
    """Pick (Bb, Tt) so the double-buffered VMEM footprint (with 8-sublane
    padding of the tiny C axis) stays under budget while each grid step moves
    multiple MiB of HBM traffic."""
    c_pad = ((C + 7) // 8) * 8                      # z blocks pad C to 8 sublanes
    per_unit = 2 * (2 * c_pad + 8) * itemsize       # z_in + z_out + mask, x2 buffers
    max_units = max(128, _VMEM_BLOCK_BUDGET // per_unit)   # max Bb * Tt

    if T <= 128:
        tt = T                                      # full extent (== array dim is legal)
    else:
        tt = min((max_units // 128) * 128, (T // 128) * 128)
        tt = max(tt, 128)
    bb = max(1, min(B, max_units // max(tt, 1)))

    def payload(bb_, tt_):                          # useful HBM bytes per grid step
        return (2 * C + 1) * bb_ * tt_ * itemsize

    # Keep enough grid steps for megacore sharding, but never drop per-step
    # payload below ~1 MiB (that would make steps overhead-bound again).
    while pl.cdiv(B, bb) * pl.cdiv(T, tt) < _MIN_GRID_STEPS:
        tt_half = max(128, (tt // 2 // 128) * 128)
        if bb > 1 and payload(bb // 2, tt) >= _MIN_STEP_PAYLOAD:
            bb //= 2
        elif tt > 128 and payload(bb, tt_half) >= _MIN_STEP_PAYLOAD:
            tt = tt_half
        else:
            break
    return bb, tt


def invertible_1x1_conv_forward(z, z_mask, log_df_dz, weight):
    B, C, T = z.shape
    assert weight.shape == (C, C)
    assert z_mask.shape == (B, 1, T)
    assert log_df_dz.shape == (B,)

    # ---- scalar / per-batch glue kept outside the hot kernel ---------------
    # TODO(synk): slogdet of the CxC parameter matrix has no clean Pallas
    # equivalent; computed once (in f32) outside the hot path.
    logdet = jnp.linalg.slogdet(weight.astype(jnp.float32))[1]
    length = jnp.sum(z_mask.astype(jnp.float32), axis=(1, 2))
    out_ldz = (log_df_dz.astype(jnp.float32) + logdet * length).astype(log_df_dz.dtype)

    # ---- tiling (no pad copy, no output slice) ------------------------------
    itemsize = jnp.dtype(z.dtype).itemsize
    bb, tt = _choose_tiles(B, C, T, itemsize)
    grid = (pl.cdiv(B, bb), pl.cdiv(T, tt))

    w_in = weight.astype(z.dtype)   # conv runs in z.dtype (mixed precision if bf16)

    cost = pl.CostEstimate(
        flops=2 * B * C * C * T,
        transcendentals=0,
        bytes_accessed=(2 * B * C * T + B * T + C * C) * itemsize,
    )

    out_z = pl.pallas_call(
        _inv1x1_kernel,
        out_shape=jax.ShapeDtypeStruct((B, C, T), z.dtype),
        grid_spec=pltpu.PrefetchScalarGridSpec(
            num_scalar_prefetch=0,
            grid=grid,
            in_specs=[
                pl.BlockSpec((C, C), lambda i, t: (0, 0)),
                pl.BlockSpec((bb, C, tt), lambda i, t: (i, 0, t)),
                pl.BlockSpec((bb, 1, tt), lambda i, t: (i, 0, t)),
            ],
            out_specs=pl.BlockSpec((bb, C, tt), lambda i, t: (i, 0, t)),
        ),
        compiler_params=pltpu.CompilerParams(
            dimension_semantics=("parallel", "parallel"),
            vmem_limit_bytes=_VMEM_LIMIT_BYTES,
        ),
        cost_estimate=cost,
    )(w_in, z, z_mask)

    return out_z, out_ldz


def _reference(z, z_mask, log_df_dz, weight):
    out = jnp.einsum("oc,bct->bot", weight, z) * z_mask
    length = jnp.sum(z_mask, axis=(1, 2))
    ldz = log_df_dz + jnp.linalg.slogdet(weight)[1] * length
    return out, ldz


def _run_case(key, B, C, T):
    k_w, k_z, k_m, k_l = jax.random.split(key, 4)
    # Deterministic orthogonal weight init (mirrors torch.linalg.qr(normal)[0]).
    w_raw = jax.random.normal(k_w, (C, C), dtype=jnp.float32)
    weight, _ = jnp.linalg.qr(w_raw)

    z = jax.random.normal(k_z, (B, C, T), dtype=jnp.float32)
    z_mask = (jax.random.uniform(k_m, (B, 1, T)) > 0.25).astype(jnp.float32)
    log_df_dz = jax.random.normal(k_l, (B,), dtype=jnp.float32)

    out_z, out_ldz = invertible_1x1_conv_forward(z, z_mask, log_df_dz, weight)
    out_z = jax.block_until_ready(out_z)
    out_ldz = jax.block_until_ready(out_ldz)

    ref_z, ref_ldz = _reference(z, z_mask, log_df_dz, weight)
    assert np.allclose(np.asarray(out_z), np.asarray(ref_z), atol=1e-5, rtol=1e-5)
    assert np.allclose(np.asarray(out_ldz), np.asarray(ref_ldz), atol=1e-5, rtol=1e-5)


if __name__ == "__main__":
    key = jax.random.PRNGKey(0)
    k1, k2 = jax.random.split(key)
    # Small shape matching the module spec (batch=2, channels=4, T=16).
    _run_case(k1, B=2, C=4, T=16)
    # Exercise the ragged-last-block path (T not a multiple of the 128-lane tile).
    _run_case(k2, B=3, C=4, T=200)
    print("KERNEL_OK")
</pallas_src>

<mosaic_0001>
module attributes {stable_mosaic.version = 11 : i64} {
  func.func @_inv1x1_kernel(%arg0: i32, %arg1: i32, %arg2: memref<4x4xf32, #tpu.memory_space<vmem>>, %arg3: memref<2x4x16xf32, #tpu.memory_space<vmem>>, %arg4: memref<2x1x16xf32, #tpu.memory_space<vmem>>, %arg5: memref<2x4x16xf32, #tpu.memory_space<vmem>>) attributes {dimension_semantics = [#tpu.dimension_semantics<parallel>, #tpu.dimension_semantics<parallel>], iteration_bounds = array<i64: 1, 1>, scalar_prefetch = 0 : i64, scratch_operands = 0 : i64, tpu.core_type = #tpu.core_type<tc>, window_params = [{pipeline_mode = #tpu.pipeline_mode<synchronous>, transform_indices = @transform_0, window_bounds = array<i64: 4, 4>}, {transform_indices = @transform_1, window_bounds = array<i64: 2, 4, 16>}, {transform_indices = @transform_2, window_bounds = array<i64: 2, 1, 16>}, {transform_indices = @transform_3, window_bounds = array<i64: 2, 4, 16>}]} {
    %c0 = arith.constant 0 : index
    %c0_0 = arith.constant 0 : index
    %0 = vector.load %arg2[%c0, %c0_0] : memref<4x4xf32, #tpu.memory_space<vmem>>, vector<4x4xf32>
    %c0_i32 = arith.constant 0 : i32
    %1 = arith.index_cast %c0_i32 : i32 to index
    %c0_1 = arith.constant 0 : index
    %c0_2 = arith.constant 0 : index
    %2 = vector.load %arg3[%1, %c0_1, %c0_2] : memref<2x4x16xf32, #tpu.memory_space<vmem>>, vector<1x4x16xf32>
    %3 = vector.shape_cast %2 : vector<1x4x16xf32> to vector<4x16xf32>
    %cst = arith.constant dense<0.000000e+00> : vector<4x16xf32>
    %4 = tpu.matmul %0, %3, %cst {dimension_numbers = #tpu.dot_dimension_numbers<[1], [0], [0], [1], [0, 0, 1, 1], [], []>} : vector<4x4xf32>, vector<4x16xf32>, vector<4x16xf32> -> vector<4x16xf32>
    %5 = arith.index_cast %c0_i32 : i32 to index
    %c0_3 = arith.constant 0 : index
    %c0_4 = arith.constant 0 : index
    %6 = vector.load %arg4[%5, %c0_3, %c0_4] : memref<2x1x16xf32, #tpu.memory_space<vmem>>, vector<1x1x16xf32>
    %7 = vector.shape_cast %6 : vector<1x1x16xf32> to vector<1x16xf32>
    %8 = vector.broadcast %7 : vector<1x16xf32> to vector<4x16xf32>
    %9 = arith.mulf %4, %8 : vector<4x16xf32>
    %10 = arith.index_cast %c0_i32 : i32 to index
    %c0_5 = arith.constant 0 : index
    %c0_6 = arith.constant 0 : index
    %11 = vector.load %arg5[%10, %c0_5, %c0_6] : memref<2x4x16xf32, #tpu.memory_space<vmem>>, vector<1x4x16xf32>
    %12 = vector.shape_cast %11 : vector<1x4x16xf32> to vector<4x16xf32>
    %13 = vector.shape_cast %9 : vector<4x16xf32> to vector<1x4x16xf32>
    tpu.vector_store %arg5[%10, %c0_5, %c0_6], %13 {strides = array<i32>} : memref<2x4x16xf32, #tpu.memory_space<vmem>>, vector<1x4x16xf32>,
    %c1_i32 = arith.constant 1 : i32
    %14 = arith.index_cast %c1_i32 : i32 to index
    %c0_7 = arith.constant 0 : index
    %c0_8 = arith.constant 0 : index
    %15 = vector.load %arg3[%14, %c0_7, %c0_8] : memref<2x4x16xf32, #tpu.memory_space<vmem>>, vector<1x4x16xf32>
    %16 = vector.shape_cast %15 : vector<1x4x16xf32> to vector<4x16xf32>
    %cst_9 = arith.constant dense<0.000000e+00> : vector<4x16xf32>
    %17 = tpu.matmul %0, %16, %cst_9 {dimension_numbers = #tpu.dot_dimension_numbers<[1], [0], [0], [1], [0, 0, 1, 1], [], []>} : vector<4x4xf32>, vector<4x16xf32>, vector<4x16xf32> -> vector<4x16xf32>
    %18 = arith.index_cast %c1_i32 : i32 to index
    %c0_10 = arith.constant 0 : index
    %c0_11 = arith.constant 0 : index
    %19 = vector.load %arg4[%18, %c0_10, %c0_11] : memref<2x1x16xf32, #tpu.memory_space<vmem>>, vector<1x1x16xf32>
    %20 = vector.shape_cast %19 : vector<1x1x16xf32> to vector<1x16xf32>
    %21 = vector.broadcast %20 : vector<1x16xf32> to vector<4x16xf32>
    %22 = arith.mulf %17, %21 : vector<4x16xf32>
    %23 = arith.index_cast %c1_i32 : i32 to index
    %c0_12 = arith.constant 0 : index
    %c0_13 = arith.constant 0 : index
    %24 = vector.load %arg5[%23, %c0_12, %c0_13] : memref<2x4x16xf32, #tpu.memory_space<vmem>>, vector<1x4x16xf32>
    %25 = vector.shape_cast %24 : vector<1x4x16xf32> to vector<4x16xf32>
    %26 = vector.shape_cast %22 : vector<4x16xf32> to vector<1x4x16xf32>
    tpu.vector_store %arg5[%23, %c0_12, %c0_13], %26 {strides = array<i32>} : memref<2x4x16xf32, #tpu.memory_space<vmem>>, vector<1x4x16xf32>,
    %c2_i32 = arith.constant 2 : i32
    return
  }
  func.func @transform_0(%arg0: i32, %arg1: i32) -> (i32, i32) {
    %c0_i32 = arith.constant 0 : i32
    %c0_i32_0 = arith.constant 0 : i32
    %c0_i32_1 = arith.constant 0 : i32
    return %c0_i32, %c0_i32_0 : i32, i32
  }
  func.func @transform_1(%arg0: i32, %arg1: i32) -> (i32, i32, i32) {
    %c0_i32 = arith.constant 0 : i32
    %c0_i32_0 = arith.constant 0 : i32
    return %arg0, %c0_i32, %arg1 : i32, i32, i32
  }
  func.func @transform_2(%arg0: i32, %arg1: i32) -> (i32, i32, i32) {
    %c0_i32 = arith.constant 0 : i32
    %c0_i32_0 = arith.constant 0 : i32
    return %arg0, %c0_i32, %arg1 : i32, i32, i32
  }
  func.func @transform_3(%arg0: i32, %arg1: i32) -> (i32, i32, i32) {
    %c0_i32 = arith.constant 0 : i32
    %c0_i32_0 = arith.constant 0 : i32
    return %arg0, %c0_i32, %arg1 : i32, i32, i32
  }
}

</mosaic_0001>

<bundles_post_ra>
// kernel: tpu_custom_call.1
= control target key start
LH: loop header
LB: loop body
LE: loop exit
PB: predicated region body
PF: predicated region fallthrough
CT: control target
= control target key end

     0   :  { %8 = vsyncpa [#allocation3], 0  ;;  %s417_s0 = inlined_call_operand.hbm [shape: f32[4,4], index: 0, kind: input, shape index: {}]   ;;  %s418_s1 = inlined_call_operand.hbm [shape: f32[2,4,16], index: 1, kind: input, shape index: {}]   ;;  %s419_s2 = inlined_call_operand.vmem [shape: f32[2,1,16], index: 2, kind: input, shape index: {}]   ;;  %s420_s3 = inlined_call_operand.hbm [shape: f32[2,4,16], index: 3, kind: output, shape index: {}]  }
   0x1   :  { %9 = vsyncpa [#allocation6], 0 }
   0x2   :  { %10 = vsyncpa [#allocation4], 0  ;;  %s335_s12 = smov [#allocation2]   ;;  %s336_s14 = smov [#allocation5]  }
   0x3   :  { %s17_s13 = sshll.u32 %s335_s12, 4  ;;  %s26_s15 = sshll.u32 %s336_s14, 4  ;;  %s18_s13 = int_to_ptr.vmem [resolvable:$true] %s17_s13  ;;  %s362_s15 = int_to_ptr.vmem [resolvable:$true] %s26_s15 }
   0x4   :  { %s263_s18 = scalar_lea.hbm %s417_s0, 64 }
   0x5   :  { %p264_p0 = scmp.ne.s32.totalorder %s417_s0, %s263_s18  ;;  %p267_p1 = scmp.lt.u32.totalorder %s263_s18, %s417_s0 }
   0x7   :  { %p269_p2 = pnand %p267_p1, %p264_p0 }
   0x9   :  { %272 = shalt.err (!%p269_p2)
}
   0xa   :  { %s273_s23 = scalar_lea.vmem %s18_s13, 64  ;;  %p278_p4 = scmp.lt.s32.totalorder %s18_s13, %s18_s13 }
   0xb   :  { %p274_p3 = scmp.ne.s32.totalorder %s18_s13, %s273_s23  ;;  %p279_p5 = scmp.lt.s32.totalorder %s273_s23, %s273_s23 }
   0xd   :  { %p280_p6 = por %p279_p5, %p278_p4 }
   0xf   :  { %p281_p7 = pnand %p280_p6, %p274_p3 }
  0x11   :  { %284 = shalt.err (!%p281_p7)
}
  0x12   :  { %20 = dma.hbm_to_vmem [thread:$0]  %s417_s0, 64, %s18_s13, [#allocation3]  }
  0x13   :  { %s285_s28 = scalar_lea.hbm %s418_s1, 128 }
  0x14   :  { %p286_p8 = scmp.ne.s32.totalorder %s418_s1, %s285_s28  ;;  %p289_p9 = scmp.lt.u32.totalorder %s285_s28, %s418_s1 }
  0x16   :  { %p291_p10 = pnand %p289_p9, %p286_p8 }
  0x18   :  { %294 = shalt.err (!%p291_p10)
}
  0x19   :  { %s295_s6 = scalar_lea.vmem %s362_s15, 128  ;;  %p300_p12 = scmp.lt.s32.totalorder %s362_s15, %s362_s15 }
  0x1a   :  { %p296_p11 = scmp.ne.s32.totalorder %s362_s15, %s295_s6  ;;  %p301_p13 = scmp.lt.s32.totalorder %s295_s6, %s295_s6 }
  0x1c   :  { %p302_p0 = por %p301_p13, %p300_p12 }
  0x1e   :  { %p303_p1 = pnand %p302_p0, %p296_p11 }
  0x20   :  { %306 = shalt.err (!%p303_p1)
}
  0x21   :  { %s337_s0 = smov 64   ;;  %s338_s7 = smov 4  }
  0x22   :  { %32 = dma.hbm_to_vmem [thread:$0]  %s418_s1, 128, %s362_s15, [#allocation6], %s337_s0, %s337_s0, %s338_s7  }
  0x23   :  { %329 = dma.done.wait [#allocation3], 64  }
  0x24   :  { %330 = vsyncadd [#allocation3], 4294967232 }
  0x25   :  { %331 = dma.done.wait [#allocation6], 128  }
  0x26   :  { %332 = vsyncadd [#allocation6], 4294967168  ;;  %v339_v0 = vmov 0.0   ;;  %vm340_vm0 = vmmov 0   ;;  %vm47_vm1 = vcmask 1043456   ;;  %vm43_vm2 = vcmask 31744  }
  0x27   :  { %246 = vmatprep.subr.mxu0 %v339_v0  ;;  %251 = vmatprep.subr.mxu1 %v339_v0  ;;  %v42_v1 = vld [vmem:[#allocation5] sm:$0xf]  ;;  %v132_v2 = vld [vmem:[#allocation5 + $0x4] sm:$0xf]  ;;  %v41_v3 = vld [vmem:[#allocation2] sm:$0xf] }
  0x28   :  { %248 = vmatprep.mubr.msk.f32.mxu0 %vm340_vm0, %v339_v0  ;;  %253 = vmatprep.mubr.msk.f32.mxu1 %vm340_vm0, %v339_v0  ;;  %v237_v4 = vld [vmem:[%s419_s2] ss:$0 sm:$0xff]  ;;  %v241_v5 = vld [vmem:[%s419_s2 + $0x1] ss:$0 sm:$0xff]  ;;  %s341_s13 = smov [#allocation7]   ;;  %vm129_vm3 = vcmask 125952  }
  0x29   :  { %247 = vmatpush3.msk.msra.mxu0 %vm47_vm1, %v42_v1  ;;  %252 = vmatpush3.msk.msra.mxu1 %vm47_vm1, %v132_v2  ;;  %s222_s14 = sshll.u32 %s341_s13, 4  ;;  %s223_s14 = int_to_ptr.vmem [resolvable:$true] %s222_s14 }
  0x2a   :  { %249 = vmatmul.mubr.msk.f32.vlgmr.msra.gmra.mrb[0].mxu0 %vm43_vm2, %v41_v3  ;;  %254 = vmatmul.mubr.msk.f32.vlgmr.msra.gmra.mrb[0].mxu1 %vm43_vm2, %v41_v3  ;;  %s307_s15 = scalar_lea.vmem %s223_s14, 128  ;;  %p312_p3 = scmp.lt.s32.totalorder %s223_s14, %s223_s14 }
  0x2b   :  { %p308_p2 = scmp.ne.s32.totalorder %s223_s14, %s307_s15  ;;  %p313_p4 = scmp.lt.s32.totalorder %s307_s15, %s307_s15 }
  0x2d   :  { %p314_p5 = por %p313_p4, %p312_p3 }
  0x2f   :  { %p315_p6 = pnand %p314_p5, %p308_p2 }
  0xfd   :  { %v117_v6 = vpop.f32.mrb[0].mxu0  ;;  %v202_v7 = vpop.f32.mrb[0].mxu1 }
  0xfe   :  { %v128_v8 = vmul.f32 %v237_v4, %v117_v6  ;;  %v214_v9 = vmul.f32 %v241_v5, %v202_v7  ;;  %v250_v10 = vpop.f32.mrb[1].mxu0  ;;  %v255_v11 = vpop.f32.mrb[1].mxu1 }
 0x100   :  { %130 = vst.msk [vmem:[#allocation7] sm:$0xf] %vm129_vm3, %v128_v8  ;;  %216 = vst.msk [vmem:[#allocation7 + $0x4] sm:$0xf] %vm129_vm3, %v214_v9 }
 0x101   :  { %318 = shalt.err (!%p315_p6)
}
 0x102   :  { %s319_s17 = scalar_lea.hbm %s420_s3, 128 }
 0x103   :  { %p320_p7 = scmp.ne.s32.totalorder %s420_s3, %s319_s17  ;;  %p323_p8 = scmp.lt.u32.totalorder %s319_s17, %s420_s3 }
 0x105   :  { %p325_p9 = pnand %p323_p8, %p320_p7 }
 0x107   :  { %328 = shalt.err (!%p325_p9)
}
 0x108   :  { %228 = dma.vmem_to_hbm [thread:$0]  %s223_s14, 128, %s420_s3, [#allocation4], %s337_s0, %s337_s0, %s338_s7  }
 0x109   :  { %333 = dma.done.wait [#allocation4], 128  }
 0x10a   :  { %334 = vsyncadd [#allocation4], 4294967168 }
 0x10b   :  { %232 = vsyncpa [#allocation3], 1 }
 0x10c   :  { %233 = vsyncpa [#allocation6], 1 }
 0x10d   :  { %234 = vsyncpa [#allocation4], 1 }

</bundles_post_ra>
